<compile_context>
chip_gen: v7x
topology: tpu7x:2x2x1
jax: 0.10.0
libtpu: 0.0.40
codegen_flags: <defaults>
</compile_context>

<pallas_src>
import functools

import jax
import jax.numpy as jnp
from jax.experimental import pallas as pl
from jax.experimental.pallas import tpu as pltpu


def _round_up(x, m):
    return ((x + m - 1) // m) * m


# -----------------------------------------------------------------------------
# Fast path: table resident in VMEM, gather via one-hot @ table on the MXU.
# -----------------------------------------------------------------------------
def _value_embed_onehot_kernel(ids_ref, tab_ref, out_ref):
    # ids_ref : (tn, 1) int32 token ids for this tile (VMEM)
    # tab_ref : (L, V, H) full stacked table, resident in VMEM (constant index_map)
    # out_ref : (L, tn, H) output block for this token tile
    tn = ids_ref.shape[0]
    L, V, H = tab_ref.shape

    ids_col = ids_ref[...]                                        # (tn, 1) int32
    iota_v = jax.lax.broadcasted_iota(jnp.int32, (tn, V), 1)      # lane-axis iota
    onehot = (ids_col == iota_v).astype(tab_ref.dtype)            # (tn, V)

    # HIGHEST only matters for f32 tables (avoid bf16-pass truncation); no-op for bf16.
    precision = (jax.lax.Precision.HIGHEST
                 if tab_ref.dtype == jnp.float32 else None)

    for l in range(L):  # L is small and static
        out_ref[l, :, :] = jnp.dot(
            onehot, tab_ref[l, :, :],
            preferred_element_type=jnp.float32,
            precision=precision,
        ).astype(out_ref.dtype)


def _forward_resident_table(ids_flat, emb_tables, *, tn, n_tiles):
    L, V, H = emb_tables.shape
    n_pad = n_tiles * tn
    dtype = emb_tables.dtype
    itemsize = jnp.dtype(dtype).itemsize

    ids_col = ids_flat.reshape(n_pad, 1)

    # Conservative VMEM estimate: (double-buffered) table + output blocks + ids + slack.
    est = 2 * (L * V * H + L * tn * H) * itemsize + 2 * tn * 4 + (1 << 20)
    cp_kwargs = dict(dimension_semantics=("parallel",))
    if est > (24 << 20):
        # Raise the scoped-VMEM default; the wrapper only takes this path when the table
        # tile is small enough to stay within v7x's 64 MiB physical VMEM.
        cp_kwargs["vmem_limit_bytes"] = min(int(est * 5 // 4), 100 << 20)

    return pl.pallas_call(
        _value_embed_onehot_kernel,
        out_shape=jax.ShapeDtypeStruct((L, n_pad, H), dtype),
        grid_spec=pltpu.PrefetchScalarGridSpec(
            num_scalar_prefetch=0,
            grid=(n_tiles,),
            in_specs=[
                pl.BlockSpec((tn, 1), lambda n: (n, 0)),          # token ids
                pl.BlockSpec((L, V, H), lambda n: (0, 0, 0)),     # resident table
            ],
            out_specs=pl.BlockSpec((L, tn, H), lambda n: (0, n, 0)),
        ),
        compiler_params=pltpu.CompilerParams(**cp_kwargs),
    )(ids_col, emb_tables)


# -----------------------------------------------------------------------------
# Fallback for large vocabularies: true HBM row gather, all L layers per token
# coalesced into one strided DMA, single shared DMA semaphore.
# -----------------------------------------------------------------------------
def _value_embed_dma_kernel(ids_smem, emb_hbm, out_ref, sem, *, tn):
    # ids_smem : (n_pad,) int32 token ids in SMEM (scalar prefetch)
    # emb_hbm  : (L, V, H) stacked tables, left in HBM (memory_space=pl.ANY)
    # out_ref  : (L, tn, H) VMEM output block for this token tile
    # sem      : single shared DMA-completion semaphore
    base = pl.program_id(0) * tn

    def _start(i, carry):
        tok = ids_smem[base + i]
        # All L layers for one token in ONE strided DMA descriptor.
        pltpu.make_async_copy(
            emb_hbm.at[:, pl.ds(tok, 1), :],   # (L, 1, H) strided rows in HBM
            out_ref.at[:, pl.ds(i, 1), :],     # (L, 1, H) slot of the output block
            sem,
        ).start()
        return carry

    jax.lax.fori_loop(0, tn, _start, 0, unroll=8)

    def _wait(i, carry):
        # Every copy has identical size, so tn same-sized waits on the shared semaphore
        # account for all outstanding copies.
        pltpu.make_async_copy(
            emb_hbm.at[:, pl.ds(0, 1), :],
            out_ref.at[:, pl.ds(0, 1), :],
            sem,
        ).wait()
        return carry

    jax.lax.fori_loop(0, tn, _wait, 0, unroll=8)


def _forward_hbm_gather(ids_flat, emb_tables, *, tn, n_tiles):
    L, V, H = emb_tables.shape
    n_pad = n_tiles * tn
    kernel = functools.partial(_value_embed_dma_kernel, tn=tn)
    return pl.pallas_call(
        kernel,
        out_shape=jax.ShapeDtypeStruct((L, n_pad, H), emb_tables.dtype),
        grid_spec=pltpu.PrefetchScalarGridSpec(
            num_scalar_prefetch=1,                          # ids -> SMEM
            grid=(n_tiles,),
            in_specs=[pl.BlockSpec(memory_space=pl.ANY)],   # tables stay in HBM
            out_specs=pl.BlockSpec((L, tn, H), lambda n, ids: (0, n, 0)),
            scratch_shapes=[pltpu.SemaphoreType.DMA],       # one shared semaphore
        ),
        compiler_params=pltpu.CompilerParams(
            dimension_semantics=("parallel",)),
    )(ids_flat, emb_tables)


# -----------------------------------------------------------------------------
# Public wrappers
# -----------------------------------------------------------------------------
def value_embedding_forward(inputs, emb_tables, *, tn=512,
                            resident_table_bytes=16 << 20):
    """ValueEmbedding forward.

    inputs:      (B, T) integer token ids.
    emb_tables:  (L, V, H) stacked embedding weights, L = num_hidden_layers // 2.

    Returns the stacked lookups as one (L, B, T, H) array (preferred for downstream
    fusion). Use `value_embedding_mirrored_list` for the 2*L list the PyTorch module
    returns.
    """
    B, T = inputs.shape
    L, V, H = emb_tables.shape
    N = B * T
    itemsize = jnp.dtype(emb_tables.dtype).itemsize

    # PyTorch nn.Embedding raises on out-of-range ids; clamp so a bad id can never turn
    # into an out-of-bounds HBM access (documented semantic divergence).
    ids = jnp.clip(inputs.reshape(-1).astype(jnp.int32), 0, V - 1)

    # Token tile: large (amortizes ~0.35us/step grid overhead) but capped so the
    # double-buffered (L, tn, H) output block stays a few MiB (v7x-safe).
    tn = max(8, (tn // 8) * 8)
    out_block_cap = 4 << 20
    tn_cap = max(8, (out_block_cap // max(1, 2 * L * H * itemsize)) // 8 * 8)
    tn = min(tn, tn_cap)
    if N <= tn:
        tn = N                                   # single tile: no padding, no tail slice
    n_pad = _round_up(N, tn)
    if n_pad != N:
        ids = jnp.concatenate([ids, jnp.zeros((n_pad - N,), jnp.int32)])
    n_tiles = n_pad // tn

    table_bytes = L * V * H * itemsize
    if table_bytes <= resident_table_bytes:
        out = _forward_resident_table(ids, emb_tables, tn=tn, n_tiles=n_tiles)
    else:
        # TODO(synk): for very long sequences, sort ids per tile so duplicate/contiguous
        # rows coalesce into fewer DMA descriptors on this latency-bound path.
        out = _forward_hbm_gather(ids, emb_tables, tn=tn, n_tiles=n_tiles)

    if n_pad != N:
        out = out[:, :N, :]                      # only hit when B*T > tn and unaligned
    return out.reshape(L, B, T, H)


def value_embedding_mirrored_list(stacked):
    """Matches the PyTorch forward: ve = [emb(x) for emb in embed]; ve += reversed(ve).

    Note: outside jit each stacked[i] materialises a copy; downstream consumers that can
    index the stacked (L, B, T, H) array directly should do so (perf-review item).
    """
    L = stacked.shape[0]
    ve = [stacked[i] for i in range(L)]
    return ve + list(reversed(ve))


if __name__ == "__main__":
    # Small ModelConfig-equivalent: vocab_size=64, hidden_size=128, num_hidden_layers=4.
    VOCAB, HIDDEN, NUM_LAYERS = 64, 128, 4
    L = NUM_LAYERS // 2
    B, T = 2, 8

    key = jax.random.PRNGKey(0)
    k_emb, k_ids = jax.random.split(key)
    # bf16 tables per the perf review (gather is dtype-agnostic and bit-exact in bf16).
    emb_tables = jax.random.normal(
        k_emb, (L, VOCAB, HIDDEN), dtype=jnp.float32).astype(jnp.bfloat16)
    inputs = jax.random.randint(k_ids, (B, T), 0, VOCAB, dtype=jnp.int32)

    stacked = value_embedding_forward(inputs, emb_tables)
    stacked = jax.block_until_ready(stacked)
    ve = value_embedding_mirrored_list(stacked)

    # Reference check against a plain JAX gather (== nn.Embedding semantics).
    ref = [emb_tables[i][inputs] for i in range(L)]
    ref = ref + list(reversed(ref))
    assert len(ve) == NUM_LAYERS
    for a, b in zip(ve, ref):
        assert a.shape == (B, T, HIDDEN)
        assert a.dtype == emb_tables.dtype
        assert bool(jnp.array_equal(a, b)), "mismatch vs reference embedding lookup"

    print("KERNEL_OK")
</pallas_src>

<mosaic_0001>
module attributes {stable_mosaic.version = 11 : i64} {
  func.func @_value_embed_onehot_kernel(%arg0: i32, %arg1: memref<16x1xi32, #tpu.memory_space<vmem>>, %arg2: memref<2x64x128xbf16, #tpu.memory_space<vmem>>, %arg3: memref<2x16x128xbf16, #tpu.memory_space<vmem>>) attributes {dimension_semantics = [#tpu.dimension_semantics<parallel>], iteration_bounds = array<i64: 1>, scalar_prefetch = 0 : i64, scratch_operands = 0 : i64, tpu.core_type = #tpu.core_type<tc>, window_params = [{transform_indices = @transform_0, window_bounds = array<i64: 16, 1>}, {pipeline_mode = #tpu.pipeline_mode<synchronous>, transform_indices = @transform_1, window_bounds = array<i64: 2, 64, 128>}, {transform_indices = @transform_2, window_bounds = array<i64: 2, 16, 128>}]} {
    %c0 = arith.constant 0 : index
    %c0_0 = arith.constant 0 : index
    %0 = vector.load %arg1[%c0, %c0_0] : memref<16x1xi32, #tpu.memory_space<vmem>>, vector<16x1xi32>
    %1 = tpu.iota {dimensions = array<i32: 1>} : vector<16x64xi32>
    %2 = vector.broadcast %0 : vector<16x1xi32> to vector<16x64xi32>
    %3 = arith.cmpi eq, %2, %1 : vector<16x64xi32>
    %4 = arith.extui %3 : vector<16x64xi1> to vector<16x64xi32>
    %5 = arith.sitofp %4 : vector<16x64xi32> to vector<16x64xf32>
    %6 = arith.truncf %5 : vector<16x64xf32> to vector<16x64xbf16>
    %c0_1 = arith.constant 0 : index
    %c0_2 = arith.constant 0 : index
    %c0_3 = arith.constant 0 : index
    %7 = vector.load %arg2[%c0_1, %c0_2, %c0_3] : memref<2x64x128xbf16, #tpu.memory_space<vmem>>, vector<1x64x128xbf16>
    %8 = vector.shape_cast %7 : vector<1x64x128xbf16> to vector<64x128xbf16>
    %cst = arith.constant dense<0.000000e+00> : vector<16x128xf32>
    %9 = tpu.matmul %6, %8, %cst {dimension_numbers = #tpu.dot_dimension_numbers<[1], [0], [0], [1], [0, 0, 1, 1], [], []>} : vector<16x64xbf16>, vector<64x128xbf16>, vector<16x128xf32> -> vector<16x128xf32>
    %10 = arith.truncf %9 : vector<16x128xf32> to vector<16x128xbf16>
    %c0_4 = arith.constant 0 : index
    %c0_5 = arith.constant 0 : index
    %c0_6 = arith.constant 0 : index
    %11 = vector.load %arg3[%c0_4, %c0_5, %c0_6] : memref<2x16x128xbf16, #tpu.memory_space<vmem>>, vector<1x16x128xbf16>
    %12 = vector.shape_cast %11 : vector<1x16x128xbf16> to vector<16x128xbf16>
    %13 = vector.shape_cast %10 : vector<16x128xbf16> to vector<1x16x128xbf16>
    tpu.vector_store %arg3[%c0_4, %c0_5, %c0_6], %13 {strides = array<i32>} : memref<2x16x128xbf16, #tpu.memory_space<vmem>>, vector<1x16x128xbf16>,
    %c1 = arith.constant 1 : index
    %c0_7 = arith.constant 0 : index
    %c0_8 = arith.constant 0 : index
    %14 = vector.load %arg2[%c1, %c0_7, %c0_8] : memref<2x64x128xbf16, #tpu.memory_space<vmem>>, vector<1x64x128xbf16>
    %15 = vector.shape_cast %14 : vector<1x64x128xbf16> to vector<64x128xbf16>
    %cst_9 = arith.constant dense<0.000000e+00> : vector<16x128xf32>
    %16 = tpu.matmul %6, %15, %cst_9 {dimension_numbers = #tpu.dot_dimension_numbers<[1], [0], [0], [1], [0, 0, 1, 1], [], []>} : vector<16x64xbf16>, vector<64x128xbf16>, vector<16x128xf32> -> vector<16x128xf32>
    %17 = arith.truncf %16 : vector<16x128xf32> to vector<16x128xbf16>
    %c1_10 = arith.constant 1 : index
    %c0_11 = arith.constant 0 : index
    %c0_12 = arith.constant 0 : index
    %18 = vector.load %arg3[%c1_10, %c0_11, %c0_12] : memref<2x16x128xbf16, #tpu.memory_space<vmem>>, vector<1x16x128xbf16>
    %19 = vector.shape_cast %18 : vector<1x16x128xbf16> to vector<16x128xbf16>
    %20 = vector.shape_cast %17 : vector<16x128xbf16> to vector<1x16x128xbf16>
    tpu.vector_store %arg3[%c1_10, %c0_11, %c0_12], %20 {strides = array<i32>} : memref<2x16x128xbf16, #tpu.memory_space<vmem>>, vector<1x16x128xbf16>,
    return
  }
  func.func @transform_0(%arg0: i32) -> (i32, i32) {
    %c0_i32 = arith.constant 0 : i32
    %c0_i32_0 = arith.constant 0 : i32
    return %arg0, %c0_i32 : i32, i32
  }
  func.func @transform_1(%arg0: i32) -> (i32, i32, i32) {
    %c0_i32 = arith.constant 0 : i32
    %c0_i32_0 = arith.constant 0 : i32
    %c0_i32_1 = arith.constant 0 : i32
    %c0_i32_2 = arith.constant 0 : i32
    return %c0_i32, %c0_i32_0, %c0_i32_1 : i32, i32, i32
  }
  func.func @transform_2(%arg0: i32) -> (i32, i32, i32) {
    %c0_i32 = arith.constant 0 : i32
    %c0_i32_0 = arith.constant 0 : i32
    %c0_i32_1 = arith.constant 0 : i32
    return %c0_i32, %arg0, %c0_i32_0 : i32, i32, i32
  }
}

</mosaic_0001>

<bundles_post_ra>
// kernel: tpu_custom_call.1
= control target key start
LH: loop header
LB: loop body
LE: loop exit
PB: predicated region body
PF: predicated region fallthrough
CT: control target
= control target key end

     0   :  { %7 = vsyncpa [#allocation3], 0  ;;  %s419_s0 = inlined_call_operand.vmem [shape: s32[16,1], index: 0, kind: input, shape index: {}]   ;;  %s420_s1 = inlined_call_operand.hbm [shape: bf16[2,64,128], index: 1, kind: input, shape index: {}]   ;;  %s421_s2 = inlined_call_operand.hbm [shape: bf16[2,16,128], index: 2, kind: output, shape index: {}]  }
   0x1   :  { %8 = vsyncpa [#allocation4], 0  ;;  %s361_s9 = smov [#allocation2]   ;;  %s313_s13 = scalar_lea.hbm %s420_s1, 1024 }
   0x2   :  { %s16_s10 = sshll.u32 %s361_s9, 4  ;;  %p314_p0 = scmp.ne.s32.totalorder %s420_s1, %s313_s13  ;;  %s17_s10 = int_to_ptr.vmem [resolvable:$true] %s16_s10 }
   0x3   :  { %p317_p1 = scmp.lt.u32.totalorder %s313_s13, %s420_s1 }
   0x5   :  { %p319_p2 = pnand %p317_p1, %p314_p0 }
   0x7   :  { %322 = shalt.err (!%p319_p2)
}
   0x8   :  { %s323_s18 = scalar_lea.vmem %s17_s10, 1024  ;;  %p328_p4 = scmp.lt.s32.totalorder %s17_s10, %s17_s10 }
   0x9   :  { %p324_p3 = scmp.ne.s32.totalorder %s17_s10, %s323_s18  ;;  %p329_p5 = scmp.lt.s32.totalorder %s323_s18, %s323_s18 }
   0xb   :  { %p330_p6 = por %p329_p5, %p328_p4 }
   0xd   :  { %p331_p7 = pnand %p330_p6, %p324_p3 }
   0xf   :  { %334 = shalt.err (!%p331_p7)
}
  0x10   :  { %s362_s19 = smov 64   ;;  %s363_s20 = smov 4  }
  0x11   :  { %22 = dma.hbm_to_vmem [thread:$0]  %s420_s1, 1024, %s17_s10, [#allocation3], %s362_s19, %s362_s19, %s363_s20  }
  0x12   :  { %357 = dma.done.wait [#allocation3], 1024  }
  0x13   :  { %358 = vsyncadd [#allocation3], 4294966272  ;;  %v364_v0 = vmov 0   ;;  %v365_v1 = vmov 0.0   ;;  %v27_v2 = vld [vmem:[%s419_s0] sm:$0xff]  ;;  %v28_v3 = vld [vmem:[%s419_s0 + $0x8] sm:$0xff]  ;;  %v29_v12 = vlaneseq }
  0x14   :  { %304 = vset.pattern.permute.xlu0 %v364_v0  ;;  %273 = vmatprep.subr.bf16.mxu0 %v365_v1  ;;  %v305_v4 = vld [vmem:[#allocation2] sm:$0xff]   ;;  %v307_v6 = vld [vmem:[#allocation2 + $0x8] sm:$0xff]   ;;  %v309_v8 = vld [vmem:[#allocation2 + $0x10] sm:$0xff]   ;;  %vm366_vm0 = vmmov 0   ;;  %vm76_vm3 = vcmask 523264   ;;  %s367_s0 = smov [#allocation5]  }
  0x15   :  { %285 = vmatprep.subr.bf16.mxu1 %v365_v1  ;;  %32 = vperm.xlu0 %304, %v27_v2   ;;  %v306_v5 = vld [vmem:[#allocation2 + $0x20] sm:$0xff]   ;;  %v308_v7 = vld [vmem:[#allocation2 + $0x28] sm:$0xff]   ;;  %v310_v9 = vld [vmem:[#allocation2 + $0x30] sm:$0xff]   ;;  %v30_v13 = vand.u32 127, %v29_v12  ;;  %s221_s1 = sshll.u32 %s367_s0, 4  ;;  %s222_s1 = int_to_ptr.vmem [resolvable:$true] %s221_s1 }
  0x16   :  { %274 = vmatpush3.bf16.msra.mxu0 %v305_v4  ;;  %286 = vmatpush3.bf16.msra.mxu1 %v306_v5  ;;  %v311_v10 = vld [vmem:[#allocation2 + $0x18] sm:$0xff]   ;;  %s335_s27 = scalar_lea.vmem %s222_s1, 256  ;;  %p340_p9 = scmp.lt.s32.totalorder %s222_s1, %s222_s1 }
  0x17   :  { %275 = vmatprep.subr.bf16.mxu0 %v365_v1  ;;  %287 = vmatprep.subr.bf16.mxu1 %v365_v1  ;;  %v312_v11 = vld [vmem:[#allocation2 + $0x38] sm:$0xff]   ;;  %p336_p8 = scmp.ne.s32.totalorder %s222_s1, %s335_s27  ;;  %p341_p10 = scmp.lt.s32.totalorder %s335_s27, %s335_s27 }
  0x18   :  { %281 = vmatprep.mubr.msk.bf16.mxu0 %vm366_vm0, %v365_v1  ;;  %293 = vmatprep.mubr.msk.bf16.mxu1 %vm366_vm0, %v365_v1 }
  0x19   :  { %35 = vperm.xlu0 %304, %v28_v3   ;;  %p342_p11 = por %p341_p10, %p340_p9 }
  0x1a   :  { %276 = vmatpush3.bf16.msra.mxu0 %v307_v6  ;;  %288 = vmatpush3.bf16.msra.mxu1 %v308_v7 }
  0x1b   :  { %277 = vmatprep.subr.bf16.mxu0 %v365_v1  ;;  %289 = vmatprep.subr.bf16.mxu1 %v365_v1  ;;  %p343_p12 = pnand %p342_p11, %p336_p8 }
  0x1e   :  { %278 = vmatpush3.bf16.msra.mxu0 %v309_v8  ;;  %290 = vmatpush3.bf16.msra.mxu1 %v310_v9 }
  0x1f   :  { %279 = vmatprep.subr.bf16.mxu0 %v365_v1  ;;  %291 = vmatprep.subr.bf16.mxu1 %v365_v1 }
  0x22   :  { %280 = vmatpush3.bf16.msra.mxu0 %v311_v10  ;;  %292 = vmatpush3.bf16.msra.mxu1 %v312_v11 }
  0x94   :  { %v33_v14 = vpop.permute.xlu0 %32 }
  0x95   :  { %vm37_vm1 = vcmp.eq.s32.totalorder %v33_v14, %v30_v13 }
  0x96   :  { %v233_v16 = vsel %vm37_vm1, 1.0, %v365_v1 }
  0x98   :  { %v36_v15 = vpop.permute.xlu0 %35 }
  0x99   :  { %vm38_vm2 = vcmp.eq.s32.totalorder %v36_v15, %v30_v13 }
  0x9a   :  { %v234_v17 = vsel %vm38_vm2, 1.0, %v365_v1 }
  0x9b   :  { %v43_v18 = vpack.c.bf16 %v234_v17, %v233_v16 }
  0x9d   :  { %282 = vmatmul.mubr.msk.bf16.vlgmr.msra.gmra.mrb[0].mxu0 %vm76_vm3, %v43_v18  ;;  %294 = vmatmul.mubr.msk.bf16.vlgmr.msra.gmra.mrb[0].mxu1 %vm76_vm3, %v43_v18 }
 0x170   :  { %v114_v19 = vpop.f32.mrb[0].mxu0  ;;  %v198_v20 = vpop.f32.mrb[0].mxu1 }
 0x171   :  { %v283_v21 = vpop.f32.mrb[1].mxu0  ;;  %v295_v22 = vpop.f32.mrb[1].mxu1 }
 0x172   :  { %v117_v23 = vpop.f32.mrb[2].mxu0  ;;  %v201_v24 = vpop.f32.mrb[2].mxu1 }
 0x173   :  { %v256_v25 = vpack.c.bf16 %v117_v23, %v114_v19  ;;  %v261_v26 = vpack.c.bf16 %v201_v24, %v198_v20  ;;  %v284_v27 = vpop.f32.mrb[3].mxu0  ;;  %v296_v28 = vpop.f32.mrb[3].mxu1 }
 0x175   :  { %257 = vst [vmem:[#allocation5] sm:$0xff] %v256_v25   ;;  %262 = vst [vmem:[#allocation5 + $0x8] sm:$0xff] %v261_v26  }
 0x176   :  { %346 = shalt.err (!%p343_p12)
}
 0x177   :  { %s347_s30 = scalar_lea.hbm %s421_s2, 256 }
 0x178   :  { %p348_p13 = scmp.ne.s32.totalorder %s421_s2, %s347_s30  ;;  %p351_p0 = scmp.lt.u32.totalorder %s347_s30, %s421_s2 }
 0x17a   :  { %p353_p1 = pnand %p351_p0, %p348_p13 }
 0x17c   :  { %356 = shalt.err (!%p353_p1)
}
 0x17d   :  { %227 = dma.vmem_to_hbm [thread:$0]  %s222_s1, 256, %s421_s2, [#allocation4], %s362_s19, %s362_s19, %s363_s20  }
 0x17e   :  { %359 = dma.done.wait [#allocation4], 256  }
 0x17f   :  { %360 = vsyncadd [#allocation4], 4294967040 }
 0x180   :  { %231 = vsyncpa [#allocation3], 1 }
 0x181   :  { %232 = vsyncpa [#allocation4], 1 }

</bundles_post_ra>
